<compile_context>
chip_gen: v6e
topology: v6e:2x2x1
jax: 0.10.0
libtpu: 0.0.40
codegen_flags: <defaults>
</compile_context>

<pallas_src>
import functools

import jax
import jax.numpy as jnp
from jax.experimental import pallas as pl
from jax.experimental.pallas import tpu as pltpu

_LANE = 128
_R_TILE_DEFAULT = 8192      # rows of 128 lanes per grid step (~4 MiB f32)


def _sublane_multiple(dtype):
    itemsize = jnp.dtype(dtype).itemsize
    return {4: 8, 2: 16, 1: 32}.get(itemsize, 8)


def _round_up(x, m):
    return -(-x // m) * m


def _jaccard_kernel(outs_ref, tgt_ref, jac_ref, inters_acc, union_acc, *,
                    threshold, n_valid, r_tile, num_k, needs_mask):
    """outs_ref: (r_tile, 128) float; tgt_ref: (r_tile, 128) int.

    Accumulates (8, 128) vreg partial sums across the feature-tile grid axis
    and finalizes (reduce, union<0.1 guard, divide) on the last tile.
    """
    k = pl.program_id(1)

    @pl.when(k == 0)
    def _init():
        inters_acc[...] = jnp.zeros_like(inters_acc)
        union_acc[...] = jnp.zeros_like(union_acc)

    def accumulate(masked):
        x = outs_ref[...]
        if x.dtype != jnp.float32:
            x = x.astype(jnp.float32)          # bf16 transport, f32 compare
        preds = (x >= threshold).astype(jnp.int32)        # (r_tile, 128)
        tgts = tgt_ref[...].astype(jnp.int32)             # no-op for int32
        inter = jnp.bitwise_and(tgts, preds).astype(jnp.float32)
        uni = jnp.bitwise_or(tgts, preds).astype(jnp.float32)
        if masked:
            # Zero contributions from out-of-bounds rows of a partial tile
            # and from lane-padding of a non-128-aligned feature count.
            rows = jax.lax.broadcasted_iota(jnp.int32, (r_tile, _LANE), 0)
            lanes = jax.lax.broadcasted_iota(jnp.int32, (r_tile, _LANE), 1)
            elem = (k * r_tile + rows) * _LANE + lanes
            keep = elem < n_valid
            inter = jnp.where(keep, inter, 0.0)
            uni = jnp.where(keep, uni, 0.0)
        # Whole-vreg accumulation: (r_tile,128)->(r_tile//8,8,128) sum over
        # the leading axis is pure VALU adds of (8,128) vregs, no XLU.
        inters_acc[...] += inter.reshape(-1, 8, _LANE).sum(axis=0)
        union_acc[...] += uni.reshape(-1, 8, _LANE).sum(axis=0)

    if not needs_mask:
        accumulate(False)
    elif num_k == 1:
        accumulate(True)
    else:
        @pl.when(k < num_k - 1)
        def _full_tiles():
            accumulate(False)

        @pl.when(k == num_k - 1)
        def _partial_tile():
            accumulate(True)

    @pl.when(k == num_k - 1)
    def _finalize():
        inters = jnp.sum(inters_acc[...])
        union = jnp.sum(union_acc[...])
        jac = jnp.where(union < 0.1, inters, inters / union)
        jac_ref[...] = jnp.full(jac_ref.shape, jac, dtype=jnp.float32)


def jaccard_score(outputs, targets, threshold, *, r_tile=_R_TILE_DEFAULT):
    """outputs: float (B, ...); targets: integer masks (B, ...)."""
    if outputs.shape[0] != targets.shape[0]:
        raise ValueError(
            "Error in JaccardScore: output batch dim must equal target batch dim")

    b = outputs.shape[0]
    f = 1
    for d in outputs.shape[1:]:
        f *= d

    # Transport dtypes: avoid extra wrapper-side passes over the big arrays.
    if outputs.dtype not in (jnp.float32, jnp.bfloat16):
        outputs = outputs.astype(jnp.float32)
    if targets.dtype == jnp.bool_:
        targets = targets.astype(jnp.int8)        # cheap 1 B/elem transport
    elif targets.dtype not in (jnp.int8, jnp.uint8, jnp.int32):
        targets = targets.astype(jnp.int32)       # matches torch .int()

    outs_flat = outputs.reshape(b, f)
    tgts_flat = targets.reshape(b, f)

    # Reshaping to (b, R, 128) needs f % 128 == 0.  Only then do we pad
    # (by < 128 elems/sample, values irrelevant: index-masked in-kernel).
    f_pad = _round_up(f, _LANE)
    r = f_pad // _LANE

    sub = max(_sublane_multiple(outs_flat.dtype),
              _sublane_multiple(tgts_flat.dtype))
    if r < sub:
        # Tiny input: make the single row-tile a multiple of 8 so the
        # in-kernel (8,128) vreg accumulation stays shape-valid.
        r_pad = _round_up(r, 8)
        rt = r_pad
    else:
        r_pad = r
        rt = max(sub, min((int(r_tile) // sub) * sub, (r // sub) * sub))

    f_pad = r_pad * _LANE
    if f_pad != f:
        outs_flat = jnp.pad(outs_flat, ((0, 0), (0, f_pad - f)))
        tgts_flat = jnp.pad(tgts_flat, ((0, 0), (0, f_pad - f)))

    num_k = -(-r_pad // rt)
    needs_mask = (f_pad != f) or (r_pad % rt != 0)

    outs3 = outs_flat.reshape(b, r_pad, _LANE)
    tgts3 = tgts_flat.reshape(b, r_pad, _LANE)

    kernel = functools.partial(
        _jaccard_kernel, threshold=float(threshold), n_valid=f,
        r_tile=rt, num_k=num_k, needs_mask=needs_mask)

    o_item = outs3.dtype.itemsize
    t_item = tgts3.dtype.itemsize
    bytes_accessed = b * f_pad * (o_item + t_item) + b * _LANE * 4
    cost = pl.CostEstimate(flops=6 * b * f_pad, transcendentals=0,
                           bytes_accessed=bytes_accessed)

    block_bytes = rt * _LANE * (o_item + t_item)
    vmem_limit = min(64 * 1024 * 1024,
                     max(32 * 1024 * 1024, 2 * block_bytes + (2 << 20)))

    per_sample = pl.pallas_call(
        kernel,
        out_shape=jax.ShapeDtypeStruct((b, 1, _LANE), jnp.float32),
        grid_spec=pltpu.PrefetchScalarGridSpec(
            num_scalar_prefetch=0,
            grid=(b, num_k),
            in_specs=[
                pl.BlockSpec((None, rt, _LANE), lambda i, k: (i, k, 0)),
                pl.BlockSpec((None, rt, _LANE), lambda i, k: (i, k, 0)),
            ],
            out_specs=pl.BlockSpec((None, 1, _LANE), lambda i, k: (i, 0, 0)),
            scratch_shapes=[
                pltpu.VMEM((8, _LANE), jnp.float32),   # inters vreg partials
                pltpu.VMEM((8, _LANE), jnp.float32),   # union  vreg partials
            ],
        ),
        compiler_params=pltpu.CompilerParams(
            dimension_semantics=("parallel", "arbitrary"),
            vmem_limit_bytes=vmem_limit),
        cost_estimate=cost,
    )(outs3, tgts3)

    jac_per_sample = per_sample[:, 0, 0]          # (B,)
    return jnp.mean(jac_per_sample)               # == accum_jac / B


def _reference_jaccard(outputs, targets, threshold):
    # Pure-JAX reference mirroring the PyTorch module, for verification.
    preds = (outputs >= threshold).astype(jnp.int32)
    tgts = targets.astype(jnp.int32)
    b = outputs.shape[0]
    accum = 0.0
    for i in range(b):
        inters = jnp.sum(jnp.bitwise_and(tgts[i], preds[i]).astype(jnp.float32))
        union = jnp.sum(jnp.bitwise_or(tgts[i], preds[i]).astype(jnp.float32))
        accum = accum + jnp.where(union < 0.1, inters, inters / union)
    return accum / float(b)


if __name__ == "__main__":
    key = jax.random.PRNGKey(0)
    k1, k2, k3, k4, k5, k6, k7, k8 = jax.random.split(key, 8)
    threshold = 0.5

    # Case 1: small f32 NCHW masks, single tile, no masking path.
    B, C, H, W = 2, 4, 16, 16
    outputs = jax.random.uniform(k1, (B, C, H, W), dtype=jnp.float32)
    targets = jax.random.bernoulli(k2, 0.5, (B, C, H, W)).astype(jnp.int32)
    score = jax.block_until_ready(jaccard_score(outputs, targets, threshold))
    ref = _reference_jaccard(outputs, targets, threshold)
    assert jnp.allclose(score, ref, atol=1e-6), (score, ref)

    # Case 2: force multi-tile accumulation + partial-last-tile row masking
    # (f = 8192 -> 64 rows, r_tile=48 -> 2 tiles, second tile 16 valid rows).
    B2, C2, H2, W2 = 2, 4, 32, 64
    outputs2 = jax.random.uniform(k3, (B2, C2, H2, W2), dtype=jnp.float32)
    targets2 = jax.random.bernoulli(k4, 0.3, (B2, C2, H2, W2)).astype(jnp.int32)
    score2 = jax.block_until_ready(
        jaccard_score(outputs2, targets2, threshold, r_tile=48))
    ref2 = _reference_jaccard(outputs2, targets2, threshold)
    assert jnp.allclose(score2, ref2, atol=1e-6), (score2, ref2)

    # Case 3: bf16 outputs stream without an f32 upcast pass.
    outputs3 = jax.random.uniform(k5, (B, C, H, W), dtype=jnp.float32
                                  ).astype(jnp.bfloat16)
    targets3 = jax.random.bernoulli(k6, 0.4, (B, C, H, W)).astype(jnp.int32)
    score3 = jax.block_until_ready(jaccard_score(outputs3, targets3, threshold))
    ref3 = _reference_jaccard(outputs3, targets3, threshold)
    assert jnp.allclose(score3, ref3, atol=1e-6), (score3, ref3)

    # Case 4: feature count not a multiple of 128 (lane masking path).
    B4, C4, H4, W4 = 2, 3, 10, 10
    outputs4 = jax.random.uniform(k7, (B4, C4, H4, W4), dtype=jnp.float32)
    targets4 = jax.random.bernoulli(k8, 0.5, (B4, C4, H4, W4)).astype(jnp.int32)
    score4 = jax.block_until_ready(jaccard_score(outputs4, targets4, threshold))
    ref4 = _reference_jaccard(outputs4, targets4, threshold)
    assert jnp.allclose(score4, ref4, atol=1e-6), (score4, ref4)

    print("KERNEL_OK")
</pallas_src>

<mosaic_0001>
module attributes {stable_mosaic.version = 11 : i64} {
  func.func @_jaccard_kernel(%arg0: i32, %arg1: i32, %arg2: memref<1x8x128xf32, #tpu.memory_space<vmem>>, %arg3: memref<1x8x128xi32, #tpu.memory_space<vmem>>, %arg4: memref<1x1x128xf32, #tpu.memory_space<vmem>>, %arg5: memref<8x128xf32, #tpu.memory_space<vmem>>, %arg6: memref<8x128xf32, #tpu.memory_space<vmem>>) attributes {dimension_semantics = [#tpu.dimension_semantics<parallel>, #tpu.dimension_semantics<arbitrary>], iteration_bounds = array<i64: 2, 1>, scalar_prefetch = 0 : i64, scratch_operands = 2 : i64, tpu.core_type = #tpu.core_type<tc>, window_params = [{transform_indices = @transform_0, window_bounds = array<i64: 1, 8, 128>}, {transform_indices = @transform_1, window_bounds = array<i64: 1, 8, 128>}, {transform_indices = @transform_2, window_bounds = array<i64: 1, 1, 128>}]} {
    %c0_i32 = arith.constant 0 : i32
    %0 = arith.cmpi eq, %arg1, %c0_i32 : i32
    %1 = arith.extui %0 : i1 to i32
    %c0_i32_0 = arith.constant 0 : i32
    %2 = arith.cmpi ne, %1, %c0_i32_0 : i32
    scf.if %2 {
      %cst_18 = arith.constant 0.000000e+00 : f32
      %27 = vector.broadcast %cst_18 : f32 to vector<8x128xf32>
      %c0_19 = arith.constant 0 : index
      %c0_20 = arith.constant 0 : index
      %28 = vector.load %arg5[%c0_19, %c0_20] : memref<8x128xf32, #tpu.memory_space<vmem>>, vector<8x128xf32>
      tpu.vector_store %arg5[%c0_19, %c0_20], %27 {strides = array<i32>} : memref<8x128xf32, #tpu.memory_space<vmem>>, vector<8x128xf32>,
      %cst_21 = arith.constant 0.000000e+00 : f32
      %29 = vector.broadcast %cst_21 : f32 to vector<8x128xf32>
      %c0_22 = arith.constant 0 : index
      %c0_23 = arith.constant 0 : index
      %30 = vector.load %arg6[%c0_22, %c0_23] : memref<8x128xf32, #tpu.memory_space<vmem>>, vector<8x128xf32>
      tpu.vector_store %arg6[%c0_22, %c0_23], %29 {strides = array<i32>} : memref<8x128xf32, #tpu.memory_space<vmem>>, vector<8x128xf32>,
    } else {
    }
    %c0 = arith.constant 0 : index
    %c0_1 = arith.constant 0 : index
    %c0_2 = arith.constant 0 : index
    %3 = vector.load %arg2[%c0, %c0_1, %c0_2] : memref<1x8x128xf32, #tpu.memory_space<vmem>>, vector<1x8x128xf32>
    %4 = vector.shape_cast %3 : vector<1x8x128xf32> to vector<8x128xf32>
    %cst = arith.constant 5.000000e-01 : f32
    %5 = vector.broadcast %cst : f32 to vector<8x128xf32>
    %6 = arith.cmpf oge, %4, %5 : vector<8x128xf32>
    %7 = arith.extui %6 : vector<8x128xi1> to vector<8x128xi32>
    %c0_3 = arith.constant 0 : index
    %c0_4 = arith.constant 0 : index
    %c0_5 = arith.constant 0 : index
    %8 = vector.load %arg3[%c0_3, %c0_4, %c0_5] : memref<1x8x128xi32, #tpu.memory_space<vmem>>, vector<1x8x128xi32>
    %9 = vector.shape_cast %8 : vector<1x8x128xi32> to vector<8x128xi32>
    %10 = arith.andi %9, %7 : vector<8x128xi32>
    %11 = arith.sitofp %10 : vector<8x128xi32> to vector<8x128xf32>
    %12 = arith.ori %9, %7 : vector<8x128xi32>
    %13 = arith.sitofp %12 : vector<8x128xi32> to vector<8x128xf32>
    %c0_6 = arith.constant 0 : index
    %c0_7 = arith.constant 0 : index
    %14 = vector.load %arg5[%c0_6, %c0_7] : memref<8x128xf32, #tpu.memory_space<vmem>>, vector<8x128xf32>
    %15 = vector.shape_cast %11 : vector<8x128xf32> to vector<1x8x128xf32>
    %cst_8 = arith.constant dense<0.000000e+00> : vector<8x128xf32>
    %16 = vector.multi_reduction <add>, %15, %cst_8 [0] : vector<1x8x128xf32> to vector<8x128xf32>
    %17 = arith.addf %14, %16 : vector<8x128xf32>
    %c0_9 = arith.constant 0 : index
    %c0_10 = arith.constant 0 : index
    %18 = vector.load %arg5[%c0_9, %c0_10] : memref<8x128xf32, #tpu.memory_space<vmem>>, vector<8x128xf32>
    tpu.vector_store %arg5[%c0_9, %c0_10], %17 {strides = array<i32>} : memref<8x128xf32, #tpu.memory_space<vmem>>, vector<8x128xf32>,
    %c0_11 = arith.constant 0 : index
    %c0_12 = arith.constant 0 : index
    %19 = vector.load %arg6[%c0_11, %c0_12] : memref<8x128xf32, #tpu.memory_space<vmem>>, vector<8x128xf32>
    %20 = vector.shape_cast %13 : vector<8x128xf32> to vector<1x8x128xf32>
    %cst_13 = arith.constant dense<0.000000e+00> : vector<8x128xf32>
    %21 = vector.multi_reduction <add>, %20, %cst_13 [0] : vector<1x8x128xf32> to vector<8x128xf32>
    %22 = arith.addf %19, %21 : vector<8x128xf32>
    %c0_14 = arith.constant 0 : index
    %c0_15 = arith.constant 0 : index
    %23 = vector.load %arg6[%c0_14, %c0_15] : memref<8x128xf32, #tpu.memory_space<vmem>>, vector<8x128xf32>
    tpu.vector_store %arg6[%c0_14, %c0_15], %22 {strides = array<i32>} : memref<8x128xf32, #tpu.memory_space<vmem>>, vector<8x128xf32>,
    %c0_i32_16 = arith.constant 0 : i32
    %24 = arith.cmpi eq, %arg1, %c0_i32_16 : i32
    %25 = arith.extui %24 : i1 to i32
    %c0_i32_17 = arith.constant 0 : i32
    %26 = arith.cmpi ne, %25, %c0_i32_17 : i32
    scf.if %26 {
      %c0_18 = arith.constant 0 : index
      %c0_19 = arith.constant 0 : index
      %27 = vector.load %arg5[%c0_18, %c0_19] : memref<8x128xf32, #tpu.memory_space<vmem>>, vector<8x128xf32>
      %28 = vector.shape_cast %27 : vector<8x128xf32> to vector<1x8x128xf32>
      %cst_20 = arith.constant dense<0.000000e+00> : vector<1xf32>
      %29 = vector.multi_reduction <add>, %28, %cst_20 [1, 2] : vector<1x8x128xf32> to vector<1xf32>
      %30 = vector.shape_cast %29 : vector<1xf32> to vector<1x1x1xf32>
      %31 = vector.extract %30[0, 0, 0] : f32 from vector<1x1x1xf32>
      %c0_21 = arith.constant 0 : index
      %c0_22 = arith.constant 0 : index
      %32 = vector.load %arg6[%c0_21, %c0_22] : memref<8x128xf32, #tpu.memory_space<vmem>>, vector<8x128xf32>
      %33 = vector.shape_cast %32 : vector<8x128xf32> to vector<1x8x128xf32>
      %cst_23 = arith.constant dense<0.000000e+00> : vector<1xf32>
      %34 = vector.multi_reduction <add>, %33, %cst_23 [1, 2] : vector<1x8x128xf32> to vector<1xf32>
      %35 = vector.shape_cast %34 : vector<1xf32> to vector<1x1x1xf32>
      %36 = vector.extract %35[0, 0, 0] : f32 from vector<1x1x1xf32>
      %cst_24 = arith.constant 1.000000e-01 : f32
      %37 = arith.cmpf olt, %36, %cst_24 : f32
      %38 = arith.divf %31, %36 : f32
      %39 = arith.select %37, %31, %38 : f32
      %40 = vector.broadcast %39 : f32 to vector<1x128xf32>
      %c0_25 = arith.constant 0 : index
      %c0_26 = arith.constant 0 : index
      %c0_27 = arith.constant 0 : index
      %41 = vector.load %arg4[%c0_25, %c0_26, %c0_27] : memref<1x1x128xf32, #tpu.memory_space<vmem>>, vector<1x1x128xf32>
      %42 = vector.shape_cast %41 : vector<1x1x128xf32> to vector<1x128xf32>
      %43 = vector.shape_cast %40 : vector<1x128xf32> to vector<1x1x128xf32>
      tpu.vector_store %arg4[%c0_25, %c0_26, %c0_27], %43 {strides = array<i32>} : memref<1x1x128xf32, #tpu.memory_space<vmem>>, vector<1x1x128xf32>,
    } else {
    }
    return
  }
  func.func @transform_0(%arg0: i32, %arg1: i32) -> (i32, i32, i32) {
    %c0_i32 = arith.constant 0 : i32
    %c0_i32_0 = arith.constant 0 : i32
    return %arg0, %arg1, %c0_i32 : i32, i32, i32
  }
  func.func @transform_1(%arg0: i32, %arg1: i32) -> (i32, i32, i32) {
    %c0_i32 = arith.constant 0 : i32
    %c0_i32_0 = arith.constant 0 : i32
    return %arg0, %arg1, %c0_i32 : i32, i32, i32
  }
  func.func @transform_2(%arg0: i32, %arg1: i32) -> (i32, i32, i32) {
    %c0_i32 = arith.constant 0 : i32
    %c0_i32_0 = arith.constant 0 : i32
    %c0_i32_1 = arith.constant 0 : i32
    return %arg0, %c0_i32, %c0_i32_0 : i32, i32, i32
  }
}

</mosaic_0001>

<bundles_post_ra>
// kernel: tpu_custom_call.1
= control target key start
LH: loop header
LB: loop body
LE: loop exit
PB: predicated region body
PF: predicated region fallthrough
CT: control target
= control target key end

     0   :  { %7 = vsyncpa [#allocation5], 0  ;;  %s797_s0 = inlined_call_operand.hbm [shape: f32[2,8,128], index: 0, kind: input, shape index: {}]   ;;  %s798_s1 = inlined_call_operand.hbm [shape: s32[2,8,128], index: 1, kind: input, shape index: {}]   ;;  %s799_s2 = inlined_call_operand.hbm [shape: f32[2,1,128], index: 2, kind: output, shape index: {}]  }
   0x1   :  { %9 = vsyncpa [#allocation5 + $0x1], 0 }
   0x2   :  { %10 = vsyncpa [#allocation8], 0 }
   0x3   :  { %12 = vsyncpa [#allocation8 + $0x1], 0 }
   0x4   :  { %13 = vsyncpa [#allocation6], 0 }
   0x5   :  { %15 = vsyncpa [#allocation6 + $0x1], 0  ;;  %s629_s9 = smov 0   ;;  %s631_s10 = smov 0  }
   0x6   :  { %s633_s11 = smov 0   ;;  %s635_s12 = smov 0  }
   0x7   :  { %s637_s13 = smov 0   ;;  %s639_s14 = smov 0  }
   0x8 LB: > { %s378_s15 = sadd.s32 4294967295, %s608_s14   ;;  %s379_s16 = sadd.s32 4294967294, %s608_s14   ;;  %s608_s14 = sphi %s639_s14, %s21_s14   ;;  %s604_s13 = sphi %s637_s13, %s811_s13   ;;  %s600_s12 = sphi %s635_s12, %s810_s12   ;;  %s596_s11 = sphi %s633_s11, %s809_s11   ;;  %s592_s10 = sphi %s631_s10, %s808_s10   ;;  %s588_s9 = sphi %s629_s9, %s807_s9  }
   0x9   : > { %s33_s17 = sadd.s32 1, %s604_s13  ;;  %s42_s18 = sadd.s32 1, %s596_s11 }
   0xa   : > { %p35_p0 = scmp.ge.s32.totalorder %s33_s17, 2  ;;  %p49_p1 = scmp.ne.s32.totalorder %s596_s11, %s592_s10 }
   0xb   : > { %p50_p2 = scmp.eq.s32.totalorder %s608_s14, 0  ;;  %p55_p3 = scmp.ne.s32.totalorder %s592_s10, %s588_s9 }
   0xc   : > { %s813_s17 = smov (%p35_p0, %s33_s17), 0  ;;  %p56_p5 = scmp.eq.s32.totalorder %s378_s15, 0 }
   0xd   : > { %p670_p4 = por %p50_p2, %p49_p1  ;;  %s37_s20 = ssub.s32 %s604_s13, %s813_s17 }
   0xe   : > { %p107_p6 = scmp.eq.s32.totalorder %s378_s15, 1  ;;  %p40_p7 = scmp.eq.s32.totalorder %s37_s20, 0 }
   0xf   : > { %p676_p8 = por %p56_p5, %p55_p3  ;;  %p113_p10 = scmp.eq.s32.totalorder %s379_s16, 1 }
  0x10   : > { %p680_p9 = por %p107_p6, %p49_p1  ;;  %p415_p13 = scmp.lt.s32.totalorder %s608_s14, 2 }
  0x11   : > { %s685_s23 = scalar_select %p40_p7, %s596_s11, %s42_s18  }
  0x12   : > { %p687_p11 = por %p113_p10, %p55_p3  ;;  %s694_s25 = sand.u32 1, %s596_s11  }
  0x13   : > { %s382_s26 = sshll.u32 %s694_s25, 3  ;;  %s383_s27 = sshll.u32 %s604_s13, 7 }
  0x14   : > { %s143_s30 = scalar_lea.hbm %s797_s0, %s383_s27  ;;  %s137_s3 = scalar_lea.vmem [#allocation4], %s382_s26 }
  0x15   : > { %s145_s4 = sshll.u32 %s137_s3, 4  ;;  %p703_p0 = pnand %p415_p13, %p670_p4  ;;  %s146_s4 = int_to_ptr.vmem [resolvable:$true] %s145_s4 }
  0x16   : > { %p386_p1 = scmp.ge.s32.totalorder %s608_s14, 1  ;;  %p169_p2 = scmp.lt.s32.totalorder %s608_s14, 3 }
  0x17   : > { %s134_s6 = scalar_lea.sflag [#allocation5], %s694_s25  ;;  %p470_p3 = pneg %p703_p0 }
  0x18   : > { %s481_s7 = scalar_lea.vmem %s146_s4, 128  ;;  %s610_s8 = smov [#allocation4]  }
  0x19   : > { %p482_p5 = scmp.ne.s32.totalorder %s146_s4, %s481_s7  ;;  %s486_s15 = sshll.u32 %s610_s8, 4  ;;  %s487_s15 = int_to_ptr.vmem [resolvable:$false] %s486_s15 }
  0x1a   : > { %s488_s16 = scalar_lea.vmem %s487_s15, 256  ;;  %p489_p4 = scmp.lt.s32.totalorder %s146_s4, %s487_s15 }
  0x1b   : > { %p484_p6 = pnand %p482_p5, %p470_p3  ;;  %p490_p10 = scmp.lt.s32.totalorder %s488_s16, %s481_s7 }
  0x1d   : > { %p485_p7 = pneg %p484_p6  ;;  %p491_p13 = por %p490_p10, %p489_p4 }
  0x1f   : > { %p492_p12 = pnand %p491_p13, %p485_p7 }
  0x21   : > { %495 = shalt.err (!%p492_p12)
}
  0x22   : > { %407 = dma.hbm_to_vmem [thread:$0]  (!%p703_p0), %s143_s30, 128, %s146_s4, %s134_s6  }
  0x23   : > { %p721_p5 = pnand %p386_p1, %p169_p2  ;;  %s162_s28 = scalar_lea.hbm %s798_s1, %s383_s27 }
  0x24   : > { %s156_s29 = scalar_lea.vmem [#allocation7], %s382_s26  ;;  %s153_s7 = scalar_lea.sflag [#allocation8], %s694_s25 }
  0x25   : > { %s164_s3 = sshll.u32 %s156_s29, 4  ;;  %s611_s30 = smov [#allocation7]   ;;  %s165_s3 = int_to_ptr.vmem [resolvable:$true] %s164_s3 }
  0x26   : > { %s509_s8 = scalar_lea.vmem %s165_s3, 128  ;;  %s514_s4 = sshll.u32 %s611_s30, 4  ;;  %s515_s4 = int_to_ptr.vmem [resolvable:$false] %s514_s4 }
  0x27   : > { %p510_p12 = scmp.ne.s32.totalorder %s165_s3, %s509_s8  ;;  %s516_s6 = scalar_lea.vmem %s515_s4, 256 }
  0x28   : > { %p517_p1 = scmp.lt.s32.totalorder %s165_s3, %s515_s4  ;;  %p518_p2 = scmp.lt.s32.totalorder %s516_s6, %s509_s8 }
  0x29   : > { %p512_p6 = pnand %p510_p12, %p470_p3 }
  0x2a   : > { %p519_p4 = por %p518_p2, %p517_p1 }
  0x2b   : > { %p513_p7 = pneg %p512_p6 }
  0x2d   : > { %p520_p10 = pnand %p519_p4, %p513_p7 }
  0x2f   : > { %523 = shalt.err (!%p520_p10)
}
  0x30   : > { %410 = dma.hbm_to_vmem [thread:$0]  (!%p703_p0), %s162_s28, 128, %s165_s3, %s153_s7  }
  0x31   : > { %173 = sbr.rel (%p721_p5) target bundleno = 350 (0x15e), region = 28  ;;  %s737_s25 = sand.u32 (!%p721_p5), 1, %s592_s10  }
  0x32   : > { %s387_s26 = sshll.u32 (!%p721_p5), %s737_s25, 3  ;;  %s176_s27 = scalar_lea.sflag (!%p721_p5), [#allocation5], %s737_s25 }
  0x33   : > { %s179_s15 = scalar_lea.vmem (!%p721_p5), [#allocation4], %s387_s26 }
  0x36   : > { %575 = dma.done.wait (%p676_p8), %s176_s27, 128  }
  0x37   : > { %577 = vsyncadd (%p676_p8), %s176_s27, 4294967168  ;;  %s185_s5 = scalar_lea.sflag [#allocation8], %s737_s25  ;;  %s188_s16 = scalar_lea.vmem [#allocation7], %s387_s26 }
  0x38   : > { %579 = dma.done.wait (%p676_p8), %s185_s5, 128  }
  0x39   : > { %581 = vsyncadd (%p676_p8), %s185_s5, 4294967168  ;;  %v219_v0 = vld [vmem:[%s179_s15] sm:$0xff]  ;;  %v222_v1 = vld [vmem:[%s188_s16] sm:$0xff]  ;;  %v612_v2 = vmov 0   ;;  %s389_s19 = sshll.u32 %s600_s12, 4  ;;  %s212_s28 = scalar_lea.vmem [#allocation9], %s737_s25 }
  0x3a   : > { %vm220_vm0 = vcmp.ge.f32.partialorder %v219_v0, 0.5  ;;  %s279_s29 = sshll.u32 %s212_s28, 4  ;;  %s755_s30 = scalar_lea.hbm %s799_s2, %s389_s19  ;;  %s280_s29 = int_to_ptr.vmem [resolvable:$true] %s279_s29 }
  0x3b   : > { %v221_v3 = vsel %vm220_vm0, 1, %v612_v2  ;;  %s267_s4 = scalar_lea.sflag [#allocation6], %s737_s25  ;;  %s524_s6 = scalar_lea.vmem %s280_s29, 16 }
  0x3c   : > { %v223_v4 = vand.u32 %v222_v1, %v221_v3  ;;  %v225_v5 = vor.u32 %v222_v1, %v221_v3  ;;  %p525_p0 = scmp.ne.s32.totalorder %s280_s29, %s524_s6  ;;  %s613_s12 = smov [#allocation9]  }
  0x3d   : > { %s528_s26 = sshll.u32 %s613_s12, 4  ;;  %s529_s26 = int_to_ptr.vmem [resolvable:$false] %s528_s26 }
  0x3e   : > { %v224_v6 = vcvt.s32.f32 %v223_v4  ;;  %v226_v7 = vcvt.s32.f32 %v225_v5  ;;  %p526_p3 = pnand %p525_p0, %p680_p9  ;;  %s530_s27 = scalar_lea.vmem %s529_s26, 32 }
  0x3f   : > { %p531_p5 = scmp.lt.s32.totalorder %s280_s29, %s529_s26  ;;  %p532_p12 = scmp.lt.s32.totalorder %s530_s27, %s524_s6 }
  0x40   : > { %239 = vadd.xlane.f32.xlu0 %v224_v6  ;;  %p527_p13 = pneg %p526_p3 }
  0x41   : > { %p533_p6 = por %p532_p12, %p531_p5 }
  0x43   : > { %p534_p7 = pnand %p533_p6, %p527_p13 }
  0x44   : > { %249 = vadd.xlane.f32.xlu0 %v226_v7 }
  0xc9   : > { %v240_v8 = vpop.xlane.xlu0 %239 }
  0xca   : > { %v241_v9 = vrot.slane %v240_v8, 4 }
  0xcc   : > { %v242_v10 = vadd.f32 %v241_v9, %v240_v8 }
  0xcd   : > { %v250_v11 = vpop.xlane.xlu0 %249 }
  0xce   : > { %v243_v12 = vrot.slane %v242_v10, 2  ;;  %v251_v13 = vrot.slane %v250_v11, 4 }
  0xd0   : > { %v252_v14 = vadd.f32 %v251_v13, %v250_v11  ;;  %v244_v15 = vadd.f32 %v243_v12, %v242_v10 }
  0xd2   : > { %v253_v16 = vrot.slane %v252_v14, 2  ;;  %v245_v17 = vrot.slane %v244_v15, 1 }
  0xd4   : > { %v254_v18 = vadd.f32 %v253_v16, %v252_v14  ;;  %v246_v19 = vadd.f32 %v245_v17, %v244_v15 }
  0xd6   : > { %392 = vpush %v246_v19  ;;  %v255_v20 = vrot.slane %v254_v18, 1 }
  0xd8   : > { %v256_v21 = vadd.f32 %v255_v20, %v254_v18 }
  0xda   : > { %394 = vpush %v256_v21 }
 0x107   : > { %s393_s21 = spop %392 }
 0x10b   : > { %s395_s18 = spop %394 }
 0x10c   : > { %v259_v22 = vstv %s395_s18  ;;  %p258_p8 = scmp.lt.f32.partialorder %s395_s18, 0.1 }
 0x10d   : > { %466 = vrcp.f32 %v259_v22 }
 0x11a   : > { %v467_v23 = vpop.eup %466 }
 0x11b   : > { %396 = vpush %v467_v23 }
 0x14c   : > { %s397_s20 = spop %396 }
 0x14d   : > { %s262_s3 = smul.f32 %s397_s20, %s393_s21 }
 0x14f   : > { %s815_s21 = smov (!%p258_p8, %s393_s21), %s262_s3 }
 0x150   : > { %v264_v24 = vstv %s815_s21 }
 0x151   : > { %265 = vst [vmem:[%s212_s28] sm:$0x1] %v264_v24 }
 0x152   : > { %537 = shalt.err (!%p534_p7)
}
 0x153   : > { %s538_s15 = scalar_lea.hbm %s755_s30, 16  ;;  %s542_s16 = scalar_lea.hbm %s799_s2, 32 }
 0x154   : > { %p539_p1 = scmp.ne.s32.totalorder %s755_s30, %s538_s15  ;;  %p543_p10 = scmp.lt.s32.totalorder %s755_s30, %s799_s2 }
 0x155   : > { %p544_p8 = scmp.lt.s32.totalorder %s542_s16, %s538_s15 }
 0x156   : > { %p540_p2 = pnand %p539_p1, %p680_p9 }
 0x157   : > { %p545_p0 = por %p544_p8, %p543_p10 }
 0x158   : > { %p541_p4 = pneg %p540_p2 }
 0x15a   : > { %p546_p3 = pnand %p545_p0, %p541_p4 }
 0x15c   : > { %549 = shalt.err (!%p546_p3)
}
 0x15d   : > { %402 = dma.vmem_to_hbm [thread:$0]  (%p680_p9), %s280_s29, 16, %s755_s30, %s267_s4  }
 0x15e PF: > { %s291_s19 = sand.u32 1, %s588_s9   ;;  %p806_p13 = scmp.ge.s32.totalorder %s608_s14, 2 }
 0x15f   : > { %s292_s20 = scalar_lea.sflag [#allocation6], %s291_s19 }
 0x160   : > { %p412_p5 = pnand %p806_p13, %p687_p11 }
 0x162   : > { %p413_p12 = pneg %p412_p5 }
 0x164   : > { %583 = dma.done.wait (%p413_p12), %s292_s20, 16  }
 0x165   : > { %585 = vsyncadd (%p413_p12), %s292_s20, 4294967280  ;;  %s21_s14 = sadd.s32 1, %s608_s14   ;;  %s807_s9 = smov %s592_s10 }
 0x166   : > { %p18_p6 = scmp.ge.s32.totalorder %s21_s14, 4   ;;  %s808_s10 = smov %s596_s11 }
 0x167   : > { %s809_s11 = smov %s685_s23  ;;  %s810_s12 = smov %s604_s13 }
 0x168   : > { %s811_s13 = smov %s813_s17  ;;  %20 = sbr.rel (!%p18_p6) target bundleno = 8 (0x8), region = 94 }
 0x16d   :  { %296 = vsyncpa [#allocation5], 1 }
 0x16e   :  { %298 = vsyncpa [#allocation5 + $0x1], 1 }
 0x16f   :  { %299 = vsyncpa [#allocation8], 1 }
 0x170   :  { %301 = vsyncpa [#allocation8 + $0x1], 1 }
 0x171   :  { %302 = vsyncpa [#allocation6], 1 }
 0x172   :  { %304 = vsyncpa [#allocation6 + $0x1], 1 }

</bundles_post_ra>
